<compile_context>
chip_gen: v6e
topology: v6e:2x2x1
jax: 0.10.0
libtpu: 0.0.40
codegen_flags: <defaults>
</compile_context>

<pallas_src>
import functools

import jax
import jax.numpy as jnp
from jax.experimental import pallas as pl
from jax.experimental.pallas import tpu as pltpu


def _round_up(a, b):
    return (a + b - 1) // b * b


def _cdiv(a, b):
    return (a + b - 1) // b


def _vmem_capacity_bytes():
    """Physical VMEM of the local TPU generation (conservative fallback: v7x)."""
    try:
        info = pltpu.get_tpu_info()
        cap = getattr(info, "vmem_capacity_bytes", None)
        if cap:
            return int(cap)
    except Exception:
        pass
    return 64 * 1024 * 1024


def _pick_channel_tile(C, sublane, row_bytes, budget):
    """Largest legal channel tile that fits the per-block byte budget."""
    if C * row_bytes <= budget:
        return C                                   # full extent: always legal
    max_fit = max(sublane, budget // max(1, row_bytes))
    # Prefer an exact divisor of C that is a multiple of the sublane count.
    best = 0
    cand = sublane
    limit = min(C, max_fit)
    while cand <= limit:
        if C % cand == 0:
            best = cand
        cand += sublane
    if best:
        return best
    # No exact divisor fits: use the largest sublane multiple that fits; the
    # last channel block is partial (out-of-bounds writes are masked by Pallas).
    tc = (max_fit // sublane) * sublane
    return max(sublane, min(tc, _round_up(C, sublane)))


def _bias_mask_kernel(x_ref, mask_ref, beta_ref, o_ref, *, scale, tc, channel_tiled):
    # x_ref:    (bn, tc, tw)   flattened-spatial tile
    # mask_ref: (bn, 1,  tw)   broadcast over channels
    # beta_ref: (1, C_pad, 1)  VMEM-resident full bias vector
    x = x_ref[...]
    mask = mask_ref[...].astype(x.dtype)
    if channel_tiled:
        c0 = pl.multiple_of(pl.program_id(2) * tc, tc)
        beta = beta_ref[:, pl.ds(c0, tc), :]
    else:
        beta = beta_ref[...]
    beta = beta.astype(x.dtype)
    if scale is not None:
        y = (x * jnp.asarray(scale, x.dtype) + beta) * mask
    else:
        y = (x + beta) * mask
    o_ref[...] = y.astype(o_ref.dtype)


def bias_mask_forward(x, mask, mask_sum, beta, scale=None, *,
                      vmem_limit_bytes=None, block_bytes_budget=None):
    """Pallas implementation of BiasMask.forward.

    x:        (N, C, H, W)
    mask:     (N, 1, H, W)   any numeric/bool dtype (cast inside the kernel)
    mask_sum: scalar (unused in forward, kept for API parity)
    beta:     (1, C, 1, 1)
    scale:    optional static Python float (corresponds to set_scale)
    """
    del mask_sum  # not used in the forward computation
    N, C, H, W = x.shape
    HW = H * W

    # Generation-specific VMEM limits / per-block budget.
    if vmem_limit_bytes is None:
        vmem_limit_bytes = min(_vmem_capacity_bytes() * 3 // 4, 96 * 1024 * 1024)
    if block_bytes_budget is None:
        # ~4 double-buffered x/out blocks + mask blocks must stay under the limit.
        block_bytes_budget = vmem_limit_bytes // 6

    # Lane-dense layout: fold H*W into the last (lane) dimension.  These
    # reshapes merge adjacent contiguous dims -> no HBM copy.
    x_f = x.reshape(N, C, HW)
    if mask.dtype == jnp.bool_:
        mask = mask.astype(jnp.int8)  # bool blocks may not lower; int8 stays narrow
    mask_f = mask.reshape(N, 1, HW)

    itemsize = jnp.dtype(x.dtype).itemsize
    m_itemsize = jnp.dtype(mask_f.dtype).itemsize
    sublane = 8 * max(1, 4 // itemsize)   # 8 (f32), 16 (bf16), 32 (int8)

    # --- lane (spatial) tile: full extent if it fits, else a multiple of 128.
    max_tw = max(128, (block_bytes_budget // (sublane * itemsize)) // 128 * 128)
    tw = HW if _round_up(HW, 128) <= max_tw else max_tw

    # --- channel tile sized against the byte budget.
    tc = _pick_channel_tile(C, sublane, tw * itemsize, block_bytes_budget)
    n_c = _cdiv(C, tc)

    # --- batch tile: fold batch elements when the per-image block is small.
    per_batch_bytes = tc * tw * itemsize + tw * m_itemsize
    bn = int(max(1, min(N, block_bytes_budget // max(1, per_batch_bytes))))

    # --- megacore guard: make sure v7x's two TensorCores both get work.
    if _cdiv(N, bn) * _cdiv(HW, tw) * n_c < 2:
        if N >= 2:
            bn = _cdiv(N, 2)
        elif HW > 128:
            tw = _round_up(_cdiv(HW, 2), 128)

    n_n, n_w = _cdiv(N, bn), _cdiv(HW, tw)
    grid = (n_n, n_w, n_c)            # channel axis innermost -> mask stays resident

    # beta: fully VMEM-resident; pad (tiny) so channel-tile slices never go OOB.
    c_pad = n_c * tc
    beta_f = beta.reshape(1, C, 1)
    if c_pad != C:
        beta_f = jnp.pad(beta_f, ((0, 0), (0, c_pad - C), (0, 0)))

    kernel = functools.partial(
        _bias_mask_kernel,
        scale=None if scale is None else float(scale),
        tc=tc, channel_tiled=(n_c > 1))

    flops_per_elt = 3 if scale is not None else 2
    cost = pl.CostEstimate(
        flops=flops_per_elt * x.size,
        transcendentals=0,
        bytes_accessed=2 * x.size * itemsize + mask_f.size * m_itemsize
                       + beta_f.size * jnp.dtype(beta_f.dtype).itemsize,
    )

    out_flat = pl.pallas_call(
        kernel,
        out_shape=jax.ShapeDtypeStruct((N, C, HW), x.dtype),
        grid_spec=pl.GridSpec(
            grid=grid,
            in_specs=[
                pl.BlockSpec((bn, tc, tw), lambda n, w, c: (n, c, w)),
                # mask index_map ignores the innermost channel axis -> stays in VMEM
                pl.BlockSpec((bn, 1, tw), lambda n, w, c: (n, 0, w)),
                # beta is fully resident: constant block index -> no per-step DMA
                pl.BlockSpec((1, c_pad, 1), lambda n, w, c: (0, 0, 0)),
            ],
            out_specs=pl.BlockSpec((bn, tc, tw), lambda n, w, c: (n, c, w)),
        ),
        compiler_params=pltpu.CompilerParams(
            dimension_semantics=("parallel", "parallel", "parallel"),
            vmem_limit_bytes=int(vmem_limit_bytes),
        ),
        cost_estimate=cost,
    )(x_f, mask_f, beta_f)

    return out_flat.reshape(N, C, H, W)


def bias_mask_reference(x, mask, beta, scale=None):
    if scale is not None:
        return (x * scale + beta) * mask
    return (x + beta) * mask


if __name__ == "__main__":
    key = jax.random.PRNGKey(0)

    def run_case(shape, scale, kseed, x_dtype=jnp.float32, mask_bool=False):
        N, C, H, W = shape
        kx, km, kb = jax.random.split(kseed, 3)
        x = jax.random.normal(kx, (N, C, H, W), dtype=jnp.float32).astype(x_dtype)
        mask_f32 = (jax.random.uniform(km, (N, 1, H, W)) > 0.3).astype(jnp.float32)
        mask = mask_f32.astype(jnp.bool_) if mask_bool else mask_f32.astype(x_dtype)
        mask_sum = float(jnp.sum(mask_f32))
        beta = (0.01 * jax.random.normal(kb, (1, C, 1, 1),
                                         dtype=jnp.float32)).astype(x_dtype)

        out = jax.block_until_ready(
            bias_mask_forward(x, mask, mask_sum, beta, scale=scale))

        ref = bias_mask_reference(x.astype(jnp.float32), mask_f32,
                                  beta.astype(jnp.float32), scale=scale)
        assert out.shape == (N, C, H, W)
        assert out.dtype == x.dtype
        tol = 1e-6 if x_dtype == jnp.float32 else 2e-2
        assert jnp.allclose(out.astype(jnp.float32), ref, atol=tol, rtol=tol), (
            f"mismatch for shape={shape} scale={scale} dtype={x_dtype}")

    k1, k2, k3, k4, k5 = jax.random.split(key, 5)
    run_case((2, 4, 16, 16), None, k1)     # scale is None
    run_case((2, 4, 16, 16), 0.5, k2)      # scale set via set_scale
    run_case((1, 4, 10, 10), 0.25, k3)     # H*W < 128 -> full-extent lane block
    run_case((2, 16, 24, 24), None, k4,    # bf16 x/beta, bool mask (cast to int8)
             x_dtype=jnp.bfloat16, mask_bool=True)
    run_case((1, 24, 56, 56), None, k5)    # N=1 -> megacore split, partial lane tile

    print("KERNEL_OK")
</pallas_src>

<mosaic_0001>
module attributes {stable_mosaic.version = 11 : i64} {
  func.func @_bias_mask_kernel(%arg0: i32, %arg1: i32, %arg2: i32, %arg3: memref<1x4x256xf32, #tpu.memory_space<vmem>>, %arg4: memref<1x1x256xf32, #tpu.memory_space<vmem>>, %arg5: memref<1x4x1xf32, #tpu.memory_space<vmem>>, %arg6: memref<1x4x256xf32, #tpu.memory_space<vmem>>) attributes {dimension_semantics = [#tpu.dimension_semantics<parallel>, #tpu.dimension_semantics<parallel>, #tpu.dimension_semantics<parallel>], iteration_bounds = array<i64: 2, 1, 1>, scalar_prefetch = 0 : i64, scratch_operands = 0 : i64, tpu.core_type = #tpu.core_type<tc>, window_params = [{transform_indices = @transform_0, window_bounds = array<i64: 1, 4, 256>}, {transform_indices = @transform_1, window_bounds = array<i64: 1, 1, 256>}, {pipeline_mode = #tpu.pipeline_mode<synchronous>, transform_indices = @transform_2, window_bounds = array<i64: 1, 4, 1>}, {transform_indices = @transform_3, window_bounds = array<i64: 1, 4, 256>}]} {
    %c0 = arith.constant 0 : index
    %c0_0 = arith.constant 0 : index
    %c0_1 = arith.constant 0 : index
    %0 = vector.load %arg3[%c0, %c0_0, %c0_1] : memref<1x4x256xf32, #tpu.memory_space<vmem>>, vector<1x4x256xf32>
    %c0_2 = arith.constant 0 : index
    %c0_3 = arith.constant 0 : index
    %c0_4 = arith.constant 0 : index
    %1 = vector.load %arg4[%c0_2, %c0_3, %c0_4] : memref<1x1x256xf32, #tpu.memory_space<vmem>>, vector<1x1x256xf32>
    %c0_5 = arith.constant 0 : index
    %c0_6 = arith.constant 0 : index
    %c0_7 = arith.constant 0 : index
    %2 = vector.load %arg5[%c0_5, %c0_6, %c0_7] : memref<1x4x1xf32, #tpu.memory_space<vmem>>, vector<1x4x1xf32>
    %3 = vector.broadcast %2 : vector<1x4x1xf32> to vector<1x4x256xf32>
    %4 = arith.addf %0, %3 : vector<1x4x256xf32>
    %5 = vector.broadcast %1 : vector<1x1x256xf32> to vector<1x4x256xf32>
    %6 = arith.mulf %4, %5 : vector<1x4x256xf32>
    %c0_8 = arith.constant 0 : index
    %c0_9 = arith.constant 0 : index
    %c0_10 = arith.constant 0 : index
    %7 = vector.load %arg6[%c0_8, %c0_9, %c0_10] : memref<1x4x256xf32, #tpu.memory_space<vmem>>, vector<1x4x256xf32>
    tpu.vector_store %arg6[%c0_8, %c0_9, %c0_10], %6 {strides = array<i32>} : memref<1x4x256xf32, #tpu.memory_space<vmem>>, vector<1x4x256xf32>,
    return
  }
  func.func @transform_0(%arg0: i32, %arg1: i32, %arg2: i32) -> (i32, i32, i32) {
    %c0_i32 = arith.constant 0 : i32
    return %arg0, %arg2, %arg1 : i32, i32, i32
  }
  func.func @transform_1(%arg0: i32, %arg1: i32, %arg2: i32) -> (i32, i32, i32) {
    %c0_i32 = arith.constant 0 : i32
    %c0_i32_0 = arith.constant 0 : i32
    return %arg0, %c0_i32, %arg1 : i32, i32, i32
  }
  func.func @transform_2(%arg0: i32, %arg1: i32, %arg2: i32) -> (i32, i32, i32) {
    %c0_i32 = arith.constant 0 : i32
    %c0_i32_0 = arith.constant 0 : i32
    %c0_i32_1 = arith.constant 0 : i32
    %c0_i32_2 = arith.constant 0 : i32
    return %c0_i32, %c0_i32_0, %c0_i32_1 : i32, i32, i32
  }
  func.func @transform_3(%arg0: i32, %arg1: i32, %arg2: i32) -> (i32, i32, i32) {
    %c0_i32 = arith.constant 0 : i32
    return %arg0, %arg2, %arg1 : i32, i32, i32
  }
}

</mosaic_0001>

<bundles_post_ra>
// kernel: tpu_custom_call.1
= control target key start
LH: loop header
LB: loop body
LE: loop exit
PB: predicated region body
PF: predicated region fallthrough
CT: control target
= control target key end

     0   :  { %8 = vsyncpa [#allocation3], 0  ;;  %s766_s0 = inlined_call_operand.hbm [shape: f32[2,4,256], index: 0, kind: input, shape index: {}]   ;;  %s767_s1 = inlined_call_operand.vmem [shape: f32[2,1,256], index: 1, kind: input, shape index: {}]   ;;  %s768_s2 = inlined_call_operand.vmem [shape: f32[1,4,1], index: 2, kind: input, shape index: {}]   ;;  %s769_s3 = inlined_call_operand.hbm [shape: f32[2,4,256], index: 3, kind: output, shape index: {}]  }
   0x1   :  { %10 = vsyncpa [#allocation3 + $0x1], 0 }
   0x2   :  { %11 = vsyncpa [#allocation4], 0 }
   0x3   :  { %13 = vsyncpa [#allocation4 + $0x1], 0  ;;  %s624_s12 = smov 0   ;;  %s626_s13 = smov 0  }
   0x4   :  { %s628_s14 = smov 0   ;;  %s630_s15 = smov 0  }
   0x5   :  { %s632_s16 = smov 0   ;;  %s634_s17 = smov 0  }
   0x6 LB: > { %s407_s18 = sadd.s32 4294967295, %s598_s17   ;;  %s408_s19 = sadd.s32 4294967294, %s598_s17   ;;  %s598_s17 = sphi %s634_s17, %s19_s17   ;;  %s594_s16 = sphi %s632_s16, %s781_s16   ;;  %s590_s15 = sphi %s630_s15, %s780_s15   ;;  %s586_s14 = sphi %s628_s14, %s779_s14   ;;  %s582_s13 = sphi %s626_s13, %s778_s13   ;;  %s578_s12 = sphi %s624_s12, %s777_s12  }
   0x7   : > { %s38_s20 = sadd.s32 1, %s594_s16  ;;  %s49_s21 = sadd.s32 1, %s586_s14 }
   0x8   : > { %p40_p0 = scmp.ge.s32.totalorder %s38_s20, 2  ;;  %p56_p1 = scmp.ne.s32.totalorder %s586_s14, %s582_s13 }
   0x9   : > { %p57_p2 = scmp.eq.s32.totalorder %s598_s17, 0  ;;  %p62_p3 = scmp.ne.s32.totalorder %s582_s13, %s578_s12 }
   0xa   : > { %s783_s20 = smov (%p40_p0, %s38_s20), 0  ;;  %p63_p5 = scmp.eq.s32.totalorder %s407_s18, 0 }
   0xb   : > { %p665_p4 = por %p57_p2, %p56_p1  ;;  %s42_s23 = ssub.s32 %s594_s16, %s783_s20 }
   0xc   : > { %p139_p6 = scmp.eq.s32.totalorder %s407_s18, 1  ;;  %p47_p7 = scmp.eq.s32.totalorder %s42_s23, 0 }
   0xd   : > { %p671_p8 = por %p63_p5, %p62_p3  ;;  %p145_p10 = scmp.eq.s32.totalorder %s408_s19, 1 }
   0xe   : > { %p675_p9 = por %p139_p6, %p56_p1  ;;  %p437_p13 = scmp.lt.s32.totalorder %s598_s17, 2 }
   0xf   : > { %s680_s26 = scalar_select %p47_p7, %s586_s14, %s49_s21  }
  0x10   : > { %p682_p11 = por %p145_p10, %p62_p3  ;;  %s168_s28 = sand.u32 1, %s586_s14  }
  0x11   : > { %s411_s29 = sshll.u32 %s168_s28, 3  ;;  %s423_s30 = sshll.u32 %s594_s16, 7 }
  0x12   : > { %s773_s27 = scalar_select %p682_p11, 1, 0 }
  0x13   : > { %s182_s6 = scalar_lea.hbm %s766_s0, %s423_s30  ;;  %s172_s7 = scalar_lea.vmem [#allocation2], %s411_s29 }
  0x14   : > { %s184_s8 = sshll.u32 %s172_s7, 4  ;;  %p695_p0 = pnand %p437_p13, %p665_p4  ;;  %s185_s8 = int_to_ptr.vmem [resolvable:$true] %s184_s8 }
  0x15   : > { %p414_p1 = scmp.ge.s32.totalorder %s598_s17, 1  ;;  %p201_p2 = scmp.lt.s32.totalorder %s598_s17, 3 }
  0x16   : > { %s169_s10 = scalar_lea.sflag [#allocation3], %s168_s28  ;;  %p492_p3 = pneg %p695_p0 }
  0x17   : > { %s503_s11 = scalar_lea.vmem %s185_s8, 128  ;;  %s600_s18 = smov [#allocation2]  }
  0x18   : > { %p504_p5 = scmp.ne.s32.totalorder %s185_s8, %s503_s11  ;;  %s508_s19 = sshll.u32 %s600_s18, 4  ;;  %s509_s19 = int_to_ptr.vmem [resolvable:$false] %s508_s19 }
  0x19   : > { %s510_s21 = scalar_lea.vmem %s509_s19, 256  ;;  %p511_p10 = scmp.lt.s32.totalorder %s185_s8, %s509_s19 }
  0x1a   : > { %p506_p6 = pnand %p504_p5, %p492_p3  ;;  %p512_p12 = scmp.lt.s32.totalorder %s510_s21, %s503_s11 }
  0x1c   : > { %p507_p7 = pneg %p506_p6  ;;  %p513_p4 = por %p512_p12, %p511_p10 }
  0x1e   : > { %p514_p13 = pnand %p513_p4, %p507_p7 }
  0x20   : > { %517 = shalt.err (!%p514_p13)
}
  0x21   : > { %432 = dma.hbm_to_vmem [thread:$0]  (!%p695_p0), %s182_s6, 128, %s185_s8, %s169_s10  }
  0x22   : > { %p202_p11 = pnand %p414_p1, %p201_p2 }
  0x23   : > { %s710_s22 = sand.u32 (!%p202_p11), 1, %s582_s13  }
  0x24   : > { %205 = sbr.rel (%p202_p11) target bundleno = 187 (0xbb), region = 32  ;;  %s415_s23 = sshll.u32 (!%p202_p11), %s710_s22, 3 }
  0x25   : > { %s208_s28 = scalar_lea.sflag (!%p202_p11), [#allocation3], %s710_s22  ;;  %s211_s29 = scalar_lea.vmem (!%p202_p11), [#allocation2], %s415_s23 }
  0x29   : > { %569 = dma.done.wait (%p671_p8), %s208_s28, 128  }
  0x2a   : > { %571 = vsyncadd (%p671_p8), %s208_s28, 4294967168  ;;  %v601_v0 = vmov 0   ;;  %v255_v1 = vld [vmem:[%s768_s2] sm:$0xf]  ;;  %p244_p11 = scmp.lt.s32.totalorder %s590_s15, 1  ;;  %v263_v2 = vlaneseq  ;;  %s424_s9 = sshll.u32 %s590_s15, 7 }
  0x2b   : > { %489 = vset.pattern.permute.xlu0 %v601_v0  ;;  %v602_v3 = vmov 839922192   ;;  %v253_v14 = vld [vmem:[%s211_s29] sm:$0xff]  ;;  %s241_s10 = scalar_lea.vmem [#allocation5], %s415_s23  ;;  %s299_s21 = scalar_lea.hbm %s769_s3, %s424_s9 }
  0x2c   : > { %258 = vperm.xlu0 %489, %v255_v1   ;;  %s245_s5 = scalar_select %p244_p11, %s590_s15, 1  ;;  %v261_v4 = vunpack.c.l.s4 %v602_v3  ;;  %v264_v5 = vshrl.u32 %v263_v2, 7 }
  0x2d   : > { %s301_s11 = sshll.u32 %s241_s10, 4  ;;  %s283_s28 = scalar_lea.sflag [#allocation4], %s710_s22  ;;  %s302_s11 = int_to_ptr.vmem [resolvable:$true] %s301_s11 }
  0x2e   : > { %s417_s6 = sshll.u32 %s245_s5, 1  ;;  %v262_v6 = vunpack.c.0.s8 %v261_v4  ;;  %v272_v7 = vsub.s32 0, %v264_v5  ;;  %v276_v8 = vsub.s32 1, %v264_v5  ;;  %s518_s30 = scalar_lea.vmem %s302_s11, 128 }
  0x2f   : > { %s250_s8 = scalar_lea.vmem %s767_s1, %s417_s6  ;;  %p519_p8 = scmp.ne.s32.totalorder %s302_s11, %s518_s30 }
  0x30   : > { %v254_v9 = vld [vmem:[%s250_s8] sm:$0x3]  ;;  %v265_v10 = vsub.s32 %v262_v6, %v264_v5  ;;  %s603_s29 = smov [#allocation5]  }
  0x31   : > { %v273_v11 = vrot.slane %v254_v9, %v272_v7  ;;  %v277_v12 = vrot.slane %v254_v9, %v276_v8  ;;  %p520_p12 = pnand %p519_p8, %p675_p9  ;;  %s522_s4 = sshll.u32 %s603_s29, 4  ;;  %s523_s4 = int_to_ptr.vmem [resolvable:$false] %s522_s4 }
  0x32   : > { %s524_s15 = scalar_lea.vmem %s523_s4, 256  ;;  %p525_p1 = scmp.lt.s32.totalorder %s302_s11, %s523_s4 }
  0x33   : > { %v278_v16 = vcombine.low %v273_v11, %v277_v12  ;;  %p521_p0 = pneg %p520_p12  ;;  %p526_p2 = scmp.lt.s32.totalorder %s524_s15, %s518_s30 }
  0x35   : > { %p527_p3 = por %p526_p2, %p525_p1 }
  0x37   : > { %p528_p5 = pnand %p527_p3, %p521_p0 }
  0xa7   : > { %v259_v13 = vpop.permute.xlu0 %258 }
  0xa8   : > { %v266_v15 = vrot.slane %v259_v13, %v265_v10 }
  0xaa   : > { %v268_v17 = vadd.f32 %v266_v15, %v253_v14 }
  0xac   : > { %v280_v18 = vmul.f32 %v278_v16, %v268_v17 }
  0xae   : > { %281 = vst [vmem:[%s241_s10] sm:$0xff] %v280_v18 }
  0xaf   : > { %531 = shalt.err (!%p528_p5)
}
  0xb0   : > { %s532_s23 = scalar_lea.hbm %s299_s21, 128  ;;  %s536_s6 = scalar_lea.hbm %s769_s3, 256 }
  0xb1   : > { %p533_p6 = scmp.ne.s32.totalorder %s299_s21, %s532_s23  ;;  %p537_p4 = scmp.lt.s32.totalorder %s299_s21, %s769_s3 }
  0xb2   : > { %p538_p13 = scmp.lt.s32.totalorder %s536_s6, %s532_s23 }
  0xb3   : > { %p534_p7 = pnand %p533_p6, %p675_p9 }
  0xb4   : > { %p539_p11 = por %p538_p13, %p537_p4 }
  0xb5   : > { %p535_p10 = pneg %p534_p7 }
  0xb7   : > { %p540_p8 = pnand %p539_p11, %p535_p10 }
  0xb9   : > { %543 = shalt.err (!%p540_p8)
}
  0xba   : > { %427 = dma.vmem_to_hbm [thread:$0]  (%p675_p9), %s302_s11, 128, %s299_s21, %s283_s28  }
  0xbb PF: > { %s313_s8 = sand.u32 1, %s578_s12   ;;  %p775_p12 = scmp.ne.s32.totalorder %s773_s27, 0 }
  0xbc   : > { %p776_p0 = scmp.ge.s32.totalorder %s598_s17, 2  ;;  %s314_s9 = scalar_lea.sflag [#allocation4], %s313_s8 }
  0xbe   : > { %p434_p1 = pnand %p776_p0, %p775_p12 }
  0xc0   : > { %p435_p2 = pneg %p434_p1 }
  0xc2   : > { %573 = dma.done.wait (%p435_p2), %s314_s9, 128  }
  0xc3   : > { %575 = vsyncadd (%p435_p2), %s314_s9, 4294967168  ;;  %s19_s17 = sadd.s32 1, %s598_s17   ;;  %s777_s12 = smov %s582_s13 }
  0xc4   : > { %p16_p3 = scmp.ge.s32.totalorder %s19_s17, 4   ;;  %s778_s13 = smov %s586_s14 }
  0xc5   : > { %s779_s14 = smov %s680_s26  ;;  %s780_s15 = smov %s594_s16 }
  0xc6   : > { %s781_s16 = smov %s783_s20  ;;  %18 = sbr.rel (!%p16_p3) target bundleno = 6 (0x6), region = 80 }
  0xcb   :  { %319 = vsyncpa [#allocation3], 1 }
  0xcc   :  { %321 = vsyncpa [#allocation3 + $0x1], 1 }
  0xcd   :  { %322 = vsyncpa [#allocation4], 1 }
  0xce   :  { %324 = vsyncpa [#allocation4 + $0x1], 1 }

</bundles_post_ra>
